<compile_context>
chip_gen: v7x
topology: tpu7x:2x2x1
jax: 0.10.0
libtpu: 0.0.40
codegen_flags: <defaults>
</compile_context>

<pallas_src>
import functools

import numpy as np
import jax
import jax.numpy as jnp
from jax.experimental import pallas as pl
from jax.experimental.pallas import tpu as pltpu

BN_EPS = 1e-5
_VMEM_LIMIT = 32 * 1024 * 1024   # explicit scoped-VMEM budget (safe on v5e/v6e/v7x)


# ----------------------------- Pallas kernels ------------------------------

def _stats_kernel(a_ref, b_ref, wa_ref, wb_ref, sa_ref, qa_ref, sb_ref, qb_ref):
    """Pass 1: accumulate per-channel sum / sum-of-squares of z = W @ x for both
    conv branches (grid over N, accumulator outputs resident in VMEM)."""
    @pl.when(pl.program_id(0) == 0)
    def _():
        sa_ref[...] = jnp.zeros_like(sa_ref)
        qa_ref[...] = jnp.zeros_like(qa_ref)
        sb_ref[...] = jnp.zeros_like(sb_ref)
        qb_ref[...] = jnp.zeros_like(qb_ref)

    za = jnp.dot(wa_ref[...], a_ref[0], preferred_element_type=jnp.float32)  # (out_c1, OHW)
    zb = jnp.dot(wb_ref[...], b_ref[0], preferred_element_type=jnp.float32)  # (out_c2, HW)
    sa_ref[...] += jnp.sum(za, axis=1, keepdims=True)
    qa_ref[...] += jnp.sum(za * za, axis=1, keepdims=True)
    sb_ref[...] += jnp.sum(zb, axis=1, keepdims=True)
    qb_ref[...] += jnp.sum(zb * zb, axis=1, keepdims=True)


def _fused_kernel(out_c1, a_ref, b_ref, wa_ref, wb_ref,
                  sca_ref, sha_ref, scb_ref, shb_ref, up_ref, o_ref):
    """Pass 2 (per batch element): conv + folded BN + ReLU for both branches,
    2x bilinear upsample of `b` as one matmul, written directly into the
    channel-concatenated output block."""
    # branch a (conv2): channels [0, out_c1)
    za = jnp.dot(wa_ref[...], a_ref[0], preferred_element_type=jnp.float32)   # (out_c1, OHW)
    o_ref[0, :out_c1, :] = jnp.maximum(za * sca_ref[...] + sha_ref[...], 0.0)

    # branch b (conv1) + 2x upsample: channels [out_c1, out_c1+out_c2)
    zb = jnp.dot(wb_ref[...], b_ref[0], preferred_element_type=jnp.float32)   # (out_c2, HW)
    yb = jnp.maximum(zb * scb_ref[...] + shb_ref[...], 0.0)
    o_ref[0, out_c1:, :] = jnp.dot(yb, up_ref[...],
                                   preferred_element_type=jnp.float32)        # (out_c2, OHW)


# ------------------------------ wrappers ------------------------------------

def _interp_matrix(in_size, out_size):
    """U[i, j] = bilinear (align_corners=True) weight of input j for output i."""
    if out_size == 1:
        src = jnp.zeros((1,), jnp.float32)
    else:
        src = jnp.arange(out_size, dtype=jnp.float32) * ((in_size - 1) / (out_size - 1))
    j = jnp.arange(in_size, dtype=jnp.float32)
    return jnp.maximum(1.0 - jnp.abs(src[:, None] - j[None, :]), 0.0)


def _bn_scale_shift(s, q, count, gamma, beta):
    """Fold batch-stat BN into per-channel scale/shift (applied to z = W @ x;
    the conv bias cancels exactly in training-mode BatchNorm)."""
    mean = s[:, 0] / count
    var = jnp.maximum(q[:, 0] / count - mean * mean, 0.0)
    scale = gamma * jax.lax.rsqrt(var + BN_EPS)
    shift = beta - mean * scale
    return scale[:, None], shift[:, None]          # (C, 1) for lane broadcast


def block_type_a_forward(params, a, b):
    n, in_c1, oh, ow = a.shape
    _, in_c2, h, w = b.shape
    assert (oh, ow) == (2 * h, 2 * w)
    out_c1 = params['conv2_w'].shape[0]     # conv2 acts on `a`
    out_c2 = params['conv1_w'].shape[0]     # conv1 acts on `b`
    ohw, hw = oh * ow, h * w
    c_tot = out_c1 + out_c2

    # NCHW -> (N, C, H*W): contiguous, zero-cost reshape (no transpose pass).
    a2 = a.reshape(n, in_c1, ohw)
    b2 = b.reshape(n, in_c2, hw)
    wa = params['conv2_w']                  # (out_c1, in_c1)
    wb = params['conv1_w']                  # (out_c2, in_c2)

    cp_acc = pltpu.CompilerParams(dimension_semantics=("arbitrary",),
                                  vmem_limit_bytes=_VMEM_LIMIT)
    cp_par = pltpu.CompilerParams(dimension_semantics=("parallel",),
                                  vmem_limit_bytes=_VMEM_LIMIT)

    # ---- pass 1: global per-channel sum / sumsq of the conv outputs ---------
    stat = lambda c: jax.ShapeDtypeStruct((c, 1), jnp.float32)
    sa, qa, sb, qb = pl.pallas_call(
        _stats_kernel,
        grid=(n,),
        out_shape=(stat(out_c1), stat(out_c1), stat(out_c2), stat(out_c2)),
        in_specs=[
            pl.BlockSpec((1, in_c1, ohw), lambda i: (i, 0, 0)),
            pl.BlockSpec((1, in_c2, hw), lambda i: (i, 0, 0)),
            pl.BlockSpec((out_c1, in_c1), lambda i: (0, 0)),
            pl.BlockSpec((out_c2, in_c2), lambda i: (0, 0)),
        ],
        out_specs=(pl.BlockSpec((out_c1, 1), lambda i: (0, 0)),
                   pl.BlockSpec((out_c1, 1), lambda i: (0, 0)),
                   pl.BlockSpec((out_c2, 1), lambda i: (0, 0)),
                   pl.BlockSpec((out_c2, 1), lambda i: (0, 0))),
        compiler_params=cp_acc,
    )(a2, b2, wa, wb)

    sc_a, sh_a = _bn_scale_shift(sa, qa, float(n * ohw),
                                 params['bn2_gamma'], params['bn2_beta'])
    sc_b, sh_b = _bn_scale_shift(sb, qb, float(n * hw),
                                 params['bn1_gamma'], params['bn1_beta'])

    # ---- 2x bilinear upsample (align_corners=True) as one lane-dense matmul --
    #   up[c, :] = y[c, :] @ kron(Uh, Uw)^T
    uh = _interp_matrix(h, oh)              # (OH, H)
    uw = _interp_matrix(w, ow)              # (OW, W)
    kt = jnp.kron(uh, uw).T                 # (H*W, OH*OW)
    # TODO(synk): for large spatial sizes switch to the separable Uh @ X @ Uw^T
    # form (the kron matrix scales as 4*(H*W)^2); fine at MLSD feature-map sizes.

    # ---- pass 2: fused conv+BN+ReLU (both branches) + upsample + concat ------
    out = pl.pallas_call(
        functools.partial(_fused_kernel, out_c1),
        grid=(n,),
        out_shape=jax.ShapeDtypeStruct((n, c_tot, ohw), jnp.float32),
        in_specs=[
            pl.BlockSpec((1, in_c1, ohw), lambda i: (i, 0, 0)),
            pl.BlockSpec((1, in_c2, hw), lambda i: (i, 0, 0)),
            pl.BlockSpec((out_c1, in_c1), lambda i: (0, 0)),
            pl.BlockSpec((out_c2, in_c2), lambda i: (0, 0)),
            pl.BlockSpec((out_c1, 1), lambda i: (0, 0)),
            pl.BlockSpec((out_c1, 1), lambda i: (0, 0)),
            pl.BlockSpec((out_c2, 1), lambda i: (0, 0)),
            pl.BlockSpec((out_c2, 1), lambda i: (0, 0)),
            pl.BlockSpec((hw, ohw), lambda i: (0, 0)),
        ],
        out_specs=pl.BlockSpec((1, c_tot, ohw), lambda i: (i, 0, 0)),
        compiler_params=cp_par,
    )(a2, b2, wa, wb, sc_a, sh_a, sc_b, sh_b, kt)

    return out.reshape(n, c_tot, oh, ow)    # (N, C, H*W) -> NCHW, zero-cost


def init_block_type_a_params(key, in_c1, in_c2, out_c1, out_c2):
    k1, k2, k3, k4 = jax.random.split(key, 4)

    def conv_init(kw, kb, cin, cout):
        bound = 1.0 / np.sqrt(cin)
        w = jax.random.uniform(kw, (cout, cin), jnp.float32, -bound, bound)
        b = jax.random.uniform(kb, (cout,), jnp.float32, -bound, bound)
        return w, b

    w1, b1 = conv_init(k1, k2, in_c2, out_c2)   # conv1 acts on `b`
    w2, b2 = conv_init(k3, k4, in_c1, out_c1)   # conv2 acts on `a`
    return dict(
        conv1_w=w1, conv1_b=b1,
        bn1_gamma=jnp.ones((out_c2,), jnp.float32),
        bn1_beta=jnp.zeros((out_c2,), jnp.float32),
        conv2_w=w2, conv2_b=b2,
        bn2_gamma=jnp.ones((out_c1,), jnp.float32),
        bn2_beta=jnp.zeros((out_c1,), jnp.float32),
    )


# --------------------------- pure-JAX reference -----------------------------

def _ref_conv_bn_relu(x, w, bias, gamma, beta):
    y = jnp.einsum('nchw,oc->nohw', x, w) + bias[None, :, None, None]
    mean = y.mean(axis=(0, 2, 3), keepdims=True)
    var = ((y - mean) ** 2).mean(axis=(0, 2, 3), keepdims=True)
    y = (y - mean) / jnp.sqrt(var + BN_EPS)
    return jnp.maximum(y * gamma[None, :, None, None] + beta[None, :, None, None], 0.0)


def _ref_upsample(x):
    n, c, h, w = x.shape
    oh, ow = 2 * h, 2 * w
    hs = jnp.arange(oh, dtype=jnp.float32) * (h - 1) / (oh - 1)
    ws = jnp.arange(ow, dtype=jnp.float32) * (w - 1) / (ow - 1)
    h0 = jnp.floor(hs).astype(jnp.int32); h1 = jnp.minimum(h0 + 1, h - 1)
    hf = (hs - h0.astype(jnp.float32))[None, None, :, None]
    w0 = jnp.floor(ws).astype(jnp.int32); w1 = jnp.minimum(w0 + 1, w - 1)
    wf = (ws - w0.astype(jnp.float32))[None, None, None, :]
    top = x[:, :, h0, :] * (1 - hf) + x[:, :, h1, :] * hf
    return top[:, :, :, w0] * (1 - wf) + top[:, :, :, w1] * wf


# ---------------------------------- main -------------------------------------

if __name__ == "__main__":
    key = jax.random.PRNGKey(0)
    in_c1, in_c2, out_c1, out_c2 = 4, 8, 8, 8
    N, Hb, Wb = 2, 8, 8
    Ha, Wa = 2 * Hb, 2 * Wb

    ka, kb, kp = jax.random.split(key, 3)
    a = jax.random.normal(ka, (N, in_c1, Ha, Wa), jnp.float32)
    b = jax.random.normal(kb, (N, in_c2, Hb, Wb), jnp.float32)
    params = init_block_type_a_params(kp, in_c1, in_c2, out_c1, out_c2)

    out = jax.block_until_ready(block_type_a_forward(params, a, b))
    assert out.shape == (N, out_c1 + out_c2, Ha, Wa), out.shape

    ref_b = _ref_conv_bn_relu(b, params['conv1_w'], params['conv1_b'],
                              params['bn1_gamma'], params['bn1_beta'])
    ref_a = _ref_conv_bn_relu(a, params['conv2_w'], params['conv2_b'],
                              params['bn2_gamma'], params['bn2_beta'])
    ref = jnp.concatenate((ref_a, _ref_upsample(ref_b)), axis=1)
    np.testing.assert_allclose(np.asarray(out), np.asarray(ref), rtol=1e-4, atol=1e-4)

    print("KERNEL_OK")
</pallas_src>

<mosaic_0001>
module attributes {stable_mosaic.version = 11 : i64} {
  func.func @_stats_kernel(%arg0: i32, %arg1: memref<1x4x256xf32, #tpu.memory_space<vmem>>, %arg2: memref<1x8x64xf32, #tpu.memory_space<vmem>>, %arg3: memref<8x4xf32, #tpu.memory_space<vmem>>, %arg4: memref<8x8xf32, #tpu.memory_space<vmem>>, %arg5: memref<8x1xf32, #tpu.memory_space<vmem>>, %arg6: memref<8x1xf32, #tpu.memory_space<vmem>>, %arg7: memref<8x1xf32, #tpu.memory_space<vmem>>, %arg8: memref<8x1xf32, #tpu.memory_space<vmem>>) attributes {dimension_semantics = [#tpu.dimension_semantics<arbitrary>], iteration_bounds = array<i64: 2>, scalar_prefetch = 0 : i64, scratch_operands = 0 : i64, tpu.core_type = #tpu.core_type<tc>, window_params = [{transform_indices = @transform_0, window_bounds = array<i64: 1, 4, 256>}, {transform_indices = @transform_1, window_bounds = array<i64: 1, 8, 64>}, {pipeline_mode = #tpu.pipeline_mode<synchronous>, transform_indices = @transform_2, window_bounds = array<i64: 8, 4>}, {pipeline_mode = #tpu.pipeline_mode<synchronous>, transform_indices = @transform_3, window_bounds = array<i64: 8, 8>}, {pipeline_mode = #tpu.pipeline_mode<synchronous>, transform_indices = @transform_4, window_bounds = array<i64: 8, 1>}, {pipeline_mode = #tpu.pipeline_mode<synchronous>, transform_indices = @transform_5, window_bounds = array<i64: 8, 1>}, {pipeline_mode = #tpu.pipeline_mode<synchronous>, transform_indices = @transform_6, window_bounds = array<i64: 8, 1>}, {pipeline_mode = #tpu.pipeline_mode<synchronous>, transform_indices = @transform_7, window_bounds = array<i64: 8, 1>}]} {
    %c0_i32 = arith.constant 0 : i32
    %0 = arith.cmpi eq, %arg0, %c0_i32 : i32
    %1 = arith.extui %0 : i1 to i32
    %c0_i32_0 = arith.constant 0 : i32
    %2 = arith.cmpi ne, %1, %c0_i32_0 : i32
    scf.if %2 {
      %cst_31 = arith.constant 0.000000e+00 : f32
      %33 = vector.broadcast %cst_31 : f32 to vector<8x1xf32>
      %c0_32 = arith.constant 0 : index
      %c0_33 = arith.constant 0 : index
      %34 = vector.load %arg5[%c0_32, %c0_33] : memref<8x1xf32, #tpu.memory_space<vmem>>, vector<8x1xf32>
      tpu.vector_store %arg5[%c0_32, %c0_33], %33 {strides = array<i32>} : memref<8x1xf32, #tpu.memory_space<vmem>>, vector<8x1xf32>,
      %cst_34 = arith.constant 0.000000e+00 : f32
      %35 = vector.broadcast %cst_34 : f32 to vector<8x1xf32>
      %c0_35 = arith.constant 0 : index
      %c0_36 = arith.constant 0 : index
      %36 = vector.load %arg6[%c0_35, %c0_36] : memref<8x1xf32, #tpu.memory_space<vmem>>, vector<8x1xf32>
      tpu.vector_store %arg6[%c0_35, %c0_36], %35 {strides = array<i32>} : memref<8x1xf32, #tpu.memory_space<vmem>>, vector<8x1xf32>,
      %cst_37 = arith.constant 0.000000e+00 : f32
      %37 = vector.broadcast %cst_37 : f32 to vector<8x1xf32>
      %c0_38 = arith.constant 0 : index
      %c0_39 = arith.constant 0 : index
      %38 = vector.load %arg7[%c0_38, %c0_39] : memref<8x1xf32, #tpu.memory_space<vmem>>, vector<8x1xf32>
      tpu.vector_store %arg7[%c0_38, %c0_39], %37 {strides = array<i32>} : memref<8x1xf32, #tpu.memory_space<vmem>>, vector<8x1xf32>,
      %cst_40 = arith.constant 0.000000e+00 : f32
      %39 = vector.broadcast %cst_40 : f32 to vector<8x1xf32>
      %c0_41 = arith.constant 0 : index
      %c0_42 = arith.constant 0 : index
      %40 = vector.load %arg8[%c0_41, %c0_42] : memref<8x1xf32, #tpu.memory_space<vmem>>, vector<8x1xf32>
      tpu.vector_store %arg8[%c0_41, %c0_42], %39 {strides = array<i32>} : memref<8x1xf32, #tpu.memory_space<vmem>>, vector<8x1xf32>,
    } else {
    }
    %c0 = arith.constant 0 : index
    %c0_1 = arith.constant 0 : index
    %3 = vector.load %arg3[%c0, %c0_1] : memref<8x4xf32, #tpu.memory_space<vmem>>, vector<8x4xf32>
    %c0_2 = arith.constant 0 : index
    %c0_3 = arith.constant 0 : index
    %c0_4 = arith.constant 0 : index
    %4 = vector.load %arg1[%c0_2, %c0_3, %c0_4] : memref<1x4x256xf32, #tpu.memory_space<vmem>>, vector<1x4x256xf32>
    %5 = vector.shape_cast %4 : vector<1x4x256xf32> to vector<4x256xf32>
    %cst = arith.constant dense<0.000000e+00> : vector<8x256xf32>
    %6 = tpu.matmul %3, %5, %cst {dimension_numbers = #tpu.dot_dimension_numbers<[1], [0], [0], [1], [0, 0, 1, 1], [], []>} : vector<8x4xf32>, vector<4x256xf32>, vector<8x256xf32> -> vector<8x256xf32>
    %c0_5 = arith.constant 0 : index
    %c0_6 = arith.constant 0 : index
    %7 = vector.load %arg4[%c0_5, %c0_6] : memref<8x8xf32, #tpu.memory_space<vmem>>, vector<8x8xf32>
    %c0_7 = arith.constant 0 : index
    %c0_8 = arith.constant 0 : index
    %c0_9 = arith.constant 0 : index
    %8 = vector.load %arg2[%c0_7, %c0_8, %c0_9] : memref<1x8x64xf32, #tpu.memory_space<vmem>>, vector<1x8x64xf32>
    %9 = vector.shape_cast %8 : vector<1x8x64xf32> to vector<8x64xf32>
    %cst_10 = arith.constant dense<0.000000e+00> : vector<8x64xf32>
    %10 = tpu.matmul %7, %9, %cst_10 {dimension_numbers = #tpu.dot_dimension_numbers<[1], [0], [0], [1], [0, 0, 1, 1], [], []>} : vector<8x8xf32>, vector<8x64xf32>, vector<8x64xf32> -> vector<8x64xf32>
    %c0_11 = arith.constant 0 : index
    %c0_12 = arith.constant 0 : index
    %11 = vector.load %arg5[%c0_11, %c0_12] : memref<8x1xf32, #tpu.memory_space<vmem>>, vector<8x1xf32>
    %cst_13 = arith.constant dense<0.000000e+00> : vector<8xf32>
    %12 = vector.multi_reduction <add>, %6, %cst_13 [1] : vector<8x256xf32> to vector<8xf32>
    %13 = vector.shape_cast %12 : vector<8xf32> to vector<8x1xf32>
    %14 = arith.addf %11, %13 : vector<8x1xf32>
    %c0_14 = arith.constant 0 : index
    %c0_15 = arith.constant 0 : index
    %15 = vector.load %arg5[%c0_14, %c0_15] : memref<8x1xf32, #tpu.memory_space<vmem>>, vector<8x1xf32>
    tpu.vector_store %arg5[%c0_14, %c0_15], %14 {strides = array<i32>} : memref<8x1xf32, #tpu.memory_space<vmem>>, vector<8x1xf32>,
    %c0_16 = arith.constant 0 : index
    %c0_17 = arith.constant 0 : index
    %16 = vector.load %arg6[%c0_16, %c0_17] : memref<8x1xf32, #tpu.memory_space<vmem>>, vector<8x1xf32>
    %17 = arith.mulf %6, %6 : vector<8x256xf32>
    %cst_18 = arith.constant dense<0.000000e+00> : vector<8xf32>
    %18 = vector.multi_reduction <add>, %17, %cst_18 [1] : vector<8x256xf32> to vector<8xf32>
    %19 = vector.shape_cast %18 : vector<8xf32> to vector<8x1xf32>
    %20 = arith.addf %16, %19 : vector<8x1xf32>
    %c0_19 = arith.constant 0 : index
    %c0_20 = arith.constant 0 : index
    %21 = vector.load %arg6[%c0_19, %c0_20] : memref<8x1xf32, #tpu.memory_space<vmem>>, vector<8x1xf32>
    tpu.vector_store %arg6[%c0_19, %c0_20], %20 {strides = array<i32>} : memref<8x1xf32, #tpu.memory_space<vmem>>, vector<8x1xf32>,
    %c0_21 = arith.constant 0 : index
    %c0_22 = arith.constant 0 : index
    %22 = vector.load %arg7[%c0_21, %c0_22] : memref<8x1xf32, #tpu.memory_space<vmem>>, vector<8x1xf32>
    %cst_23 = arith.constant dense<0.000000e+00> : vector<8xf32>
    %23 = vector.multi_reduction <add>, %10, %cst_23 [1] : vector<8x64xf32> to vector<8xf32>
    %24 = vector.shape_cast %23 : vector<8xf32> to vector<8x1xf32>
    %25 = arith.addf %22, %24 : vector<8x1xf32>
    %c0_24 = arith.constant 0 : index
    %c0_25 = arith.constant 0 : index
    %26 = vector.load %arg7[%c0_24, %c0_25] : memref<8x1xf32, #tpu.memory_space<vmem>>, vector<8x1xf32>
    tpu.vector_store %arg7[%c0_24, %c0_25], %25 {strides = array<i32>} : memref<8x1xf32, #tpu.memory_space<vmem>>, vector<8x1xf32>,
    %c0_26 = arith.constant 0 : index
    %c0_27 = arith.constant 0 : index
    %27 = vector.load %arg8[%c0_26, %c0_27] : memref<8x1xf32, #tpu.memory_space<vmem>>, vector<8x1xf32>
    %28 = arith.mulf %10, %10 : vector<8x64xf32>
    %cst_28 = arith.constant dense<0.000000e+00> : vector<8xf32>
    %29 = vector.multi_reduction <add>, %28, %cst_28 [1] : vector<8x64xf32> to vector<8xf32>
    %30 = vector.shape_cast %29 : vector<8xf32> to vector<8x1xf32>
    %31 = arith.addf %27, %30 : vector<8x1xf32>
    %c0_29 = arith.constant 0 : index
    %c0_30 = arith.constant 0 : index
    %32 = vector.load %arg8[%c0_29, %c0_30] : memref<8x1xf32, #tpu.memory_space<vmem>>, vector<8x1xf32>
    tpu.vector_store %arg8[%c0_29, %c0_30], %31 {strides = array<i32>} : memref<8x1xf32, #tpu.memory_space<vmem>>, vector<8x1xf32>,
    return
  }
  func.func @transform_0(%arg0: i32) -> (i32, i32, i32) {
    %c0_i32 = arith.constant 0 : i32
    %c0_i32_0 = arith.constant 0 : i32
    %c0_i32_1 = arith.constant 0 : i32
    return %arg0, %c0_i32, %c0_i32_0 : i32, i32, i32
  }
  func.func @transform_1(%arg0: i32) -> (i32, i32, i32) {
    %c0_i32 = arith.constant 0 : i32
    %c0_i32_0 = arith.constant 0 : i32
    %c0_i32_1 = arith.constant 0 : i32
    return %arg0, %c0_i32, %c0_i32_0 : i32, i32, i32
  }
  func.func @transform_2(%arg0: i32) -> (i32, i32) {
    %c0_i32 = arith.constant 0 : i32
    %c0_i32_0 = arith.constant 0 : i32
    %c0_i32_1 = arith.constant 0 : i32
    return %c0_i32, %c0_i32_0 : i32, i32
  }
  func.func @transform_3(%arg0: i32) -> (i32, i32) {
    %c0_i32 = arith.constant 0 : i32
    %c0_i32_0 = arith.constant 0 : i32
    %c0_i32_1 = arith.constant 0 : i32
    return %c0_i32, %c0_i32_0 : i32, i32
  }
  func.func @transform_4(%arg0: i32) -> (i32, i32) {
    %c0_i32 = arith.constant 0 : i32
    %c0_i32_0 = arith.constant 0 : i32
    %c0_i32_1 = arith.constant 0 : i32
    return %c0_i32, %c0_i32_0 : i32, i32
  }
  func.func @transform_5(%arg0: i32) -> (i32, i32) {
    %c0_i32 = arith.constant 0 : i32
    %c0_i32_0 = arith.constant 0 : i32
    %c0_i32_1 = arith.constant 0 : i32
    return %c0_i32, %c0_i32_0 : i32, i32
  }
  func.func @transform_6(%arg0: i32) -> (i32, i32) {
    %c0_i32 = arith.constant 0 : i32
    %c0_i32_0 = arith.constant 0 : i32
    %c0_i32_1 = arith.constant 0 : i32
    return %c0_i32, %c0_i32_0 : i32, i32
  }
  func.func @transform_7(%arg0: i32) -> (i32, i32) {
    %c0_i32 = arith.constant 0 : i32
    %c0_i32_0 = arith.constant 0 : i32
    %c0_i32_1 = arith.constant 0 : i32
    return %c0_i32, %c0_i32_0 : i32, i32
  }
}

</mosaic_0001>

<bundles_post_ra>
// kernel: tpu_custom_call.1
= control target key start
LH: loop header
LB: loop body
LE: loop exit
PB: predicated region body
PF: predicated region fallthrough
CT: control target
= control target key end

     0   :  { %13 = vsyncpa [#allocation3], 0  ;;  %s1000_s0 = inlined_call_operand.hbm [shape: f32[2,4,256], index: 0, kind: input, shape index: {}]   ;;  %s1001_s1 = inlined_call_operand.hbm [shape: f32[2,8,64], index: 1, kind: input, shape index: {}]   ;;  %s1002_s2 = inlined_call_operand.vmem [shape: f32[8,4], index: 2, kind: input, shape index: {}]   ;;  %s1003_s3 = inlined_call_operand.vmem [shape: f32[8,8], index: 3, kind: input, shape index: {}]   ;;  %s1004_s4 = inlined_call_operand.vmem [shape: f32[8,1], index: 4, kind: output, shape index: {0}]   ;;  %s1005_s5 = inlined_call_operand.vmem [shape: f32[8,1], index: 5, kind: output, shape index: {1}]   ;;  %s1006_s6 = inlined_call_operand.vmem [shape: f32[8,1], index: 6, kind: output, shape index: {2}]   ;;  %s1007_s7 = inlined_call_operand.vmem [shape: f32[8,1], index: 7, kind: output, shape index: {3}]  }
   0x1   :  { %15 = vsyncpa [#allocation3 + $0x1], 0 }
   0x2   :  { %16 = vsyncpa [#allocation5], 0 }
   0x3   :  { %18 = vsyncpa [#allocation5 + $0x1], 0  ;;  %s808_s24 = smov 0   ;;  %s810_s25 = smov 0  }
   0x4   :  { %s812_s26 = smov 0   ;;  %s814_s27 = smov 0  }
   0x5 LB: > { %s589_s28 = sadd.s32 4294967295, %s761_s27   ;;  %s828_s29 = sadd.s32 1, %s761_s27   ;;  %s761_s27 = sphi %s814_s27, %s1019_s27   ;;  %s757_s26 = sphi %s812_s26, %s1018_s26   ;;  %s753_s25 = sphi %s810_s25, %s1017_s25   ;;  %s749_s24 = sphi %s808_s24, %s1016_s24  }
   0x6   : > { %s28_s30 = ssub.s32 %s761_s27, %s828_s29  ;;  %s31_s8 = sadd.s32 1, %s757_s26 }
   0x7   : > { %p29_p0 = scmp.eq.s32.totalorder %s28_s30, 0  ;;  %p38_p1 = scmp.ne.s32.totalorder %s757_s26, %s753_s25 }
   0x8   : > { %p39_p2 = scmp.eq.s32.totalorder %s761_s27, 0  ;;  %p44_p3 = scmp.ne.s32.totalorder %s753_s25, %s749_s24 }
   0x9   : > { %s838_s9 = scalar_select %p29_p0, %s757_s26, %s31_s8  }
   0xa   : > { %p40_p4 = por %p39_p2, %p38_p1  ;;  %p45_p5 = scmp.eq.s32.totalorder %s589_s28, 0 }
   0xb   : > { %p626_p6 = scmp.lt.s32.totalorder %s761_s27, 2  ;;  %s848_s11 = sand.u32 1, %s757_s26  }
   0xc   : > { %p843_p7 = por %p45_p5, %p44_p3  ;;  %s592_s12 = sshll.u32 %s848_s11, 3 }
   0xd   : > { %s607_s13 = sshll.u32 %s761_s27, 7  ;;  %s230_s17 = scalar_lea.vmem [#allocation2], %s592_s12 }
   0xe   : > { %s1009_s10 = scalar_select %p843_p7, 1, 0 }
   0xf   : > { %s857_s16 = scalar_lea.hbm %s1000_s0, %s607_s13  ;;  %s238_s18 = sshll.u32 %s230_s17, 4  ;;  %s861_s18 = int_to_ptr.vmem [resolvable:$true] %s238_s18 }
  0x10   : > { %p863_p8 = pnand %p626_p6, %p40_p4  ;;  %s227_s20 = scalar_lea.sflag [#allocation3], %s848_s11 }
  0x11   : > { %s663_s21 = scalar_lea.hbm %s857_s16, 128  ;;  %s668_s24 = scalar_lea.hbm %s1000_s0, 256 }
  0x12   : > { %p664_p11 = scmp.ne.s32.totalorder %s857_s16, %s663_s21  ;;  %p665_p12 = pneg %p863_p8 }
  0x13   : > { %p669_p1 = scmp.lt.u32.totalorder %s857_s16, %s1000_s0  ;;  %p670_p2 = scmp.lt.u32.totalorder %s668_s24, %s663_s21 }
  0x14   : > { %p666_p13 = pnand %p665_p12, %p664_p11  ;;  %p672_p4 = scmp.lt.u32.totalorder %s663_s21, %s857_s16 }
  0x15   : > { %p671_p3 = por %p670_p2, %p669_p1 }
  0x16   : > { %p667_p0 = pneg %p666_p13 }
  0x17   : > { %p673_p5 = por %p672_p4, %p671_p3 }
  0x19   : > { %p674_p6 = pnand %p673_p5, %p667_p0 }
  0x1b   : > { %677 = shalt.err (!%p674_p6)
}
  0x1c   : > { %s678_s14 = scalar_lea.vmem %s861_s18, 128  ;;  %s763_s15 = smov [#allocation2]  }
  0x1d   : > { %p679_p11 = scmp.ne.s32.totalorder %s861_s18, %s678_s14  ;;  %s683_s17 = sshll.u32 %s763_s15, 4  ;;  %s684_s17 = int_to_ptr.vmem [resolvable:$false] %s683_s17 }
  0x1e   : > { %s685_s22 = scalar_lea.vmem %s684_s17, 256  ;;  %p686_p10 = scmp.lt.s32.totalorder %s861_s18, %s684_s17 }
  0x1f   : > { %p681_p13 = pnand %p679_p11, %p665_p12  ;;  %p687_p1 = scmp.lt.s32.totalorder %s685_s22, %s678_s14 }
  0x21   : > { %p682_p9 = pneg %p681_p13  ;;  %p688_p2 = por %p687_p1, %p686_p10 }
  0x23   : > { %p689_p3 = pnand %p688_p2, %p682_p9 }
  0x25   : > { %692 = shalt.err (!%p689_p3)
}
  0x26   : > { %622 = dma.hbm_to_vmem [thread:$0]  (!%p863_p8), %s857_s16, 128, %s861_s18, %s227_s20  }
  0x27   : > { %p1011_p0 = scmp.lt.s32.totalorder %s761_s27, 3  ;;  %p1012_p4 = scmp.ge.s32.totalorder %s761_s27, 1 }
  0x28   : > { %s908_s30 = scalar_lea.hbm %s1001_s1, %s607_s13  ;;  %s249_s8 = scalar_lea.vmem [#allocation4], %s592_s12 }
  0x29   : > { %p899_p5 = pnand %p1012_p4, %p1011_p0  ;;  %s256_s14 = sshll.u32 %s249_s8, 4  ;;  %s257_s14 = int_to_ptr.vmem [resolvable:$true] %s256_s14 }
  0x2a   : > { %s246_s16 = scalar_lea.sflag [#allocation5], %s848_s11  ;;  %s693_s18 = scalar_lea.hbm %s908_s30, 128 }
  0x2b   : > { %s1013_s21 = scalar_select %p899_p5, 1, 0 }
  0x2c   : > { %p694_p9 = scmp.ne.s32.totalorder %s908_s30, %s693_s18  ;;  %s698_s13 = scalar_lea.hbm %s1001_s1, 256 }
  0x2d   : > { %p699_p11 = scmp.lt.u32.totalorder %s908_s30, %s1001_s1  ;;  %p700_p13 = scmp.lt.u32.totalorder %s698_s13, %s693_s18 }
  0x2e   : > { %p696_p10 = pnand %p694_p9, %p665_p12  ;;  %p702_p2 = scmp.lt.u32.totalorder %s693_s18, %s908_s30 }
  0x2f   : > { %p701_p1 = por %p700_p13, %p699_p11 }
  0x30   : > { %p697_p6 = pneg %p696_p10 }
  0x31   : > { %p703_p3 = por %p702_p2, %p701_p1 }
  0x33   : > { %p704_p0 = pnand %p703_p3, %p697_p6 }
  0x35   : > { %707 = shalt.err (!%p704_p0)
}
  0x36   : > { %s708_s11 = scalar_lea.vmem %s257_s14, 128  ;;  %s764_s12 = smov [#allocation4]  }
  0x37   : > { %p709_p4 = scmp.ne.s32.totalorder %s257_s14, %s708_s11  ;;  %s713_s23 = sshll.u32 %s764_s12, 4  ;;  %s714_s23 = int_to_ptr.vmem [resolvable:$false] %s713_s23 }
  0x38   : > { %s715_s24 = scalar_lea.vmem %s714_s23, 256  ;;  %p716_p7 = scmp.lt.s32.totalorder %s257_s14, %s714_s23 }
  0x39   : > { %p711_p9 = pnand %p709_p4, %p665_p12  ;;  %p717_p5 = scmp.lt.s32.totalorder %s715_s24, %s708_s11 }
  0x3b   : > { %p712_p10 = pneg %p711_p9  ;;  %p718_p11 = por %p717_p5, %p716_p7 }
  0x3d   : > { %p719_p13 = pnand %p718_p11, %p712_p10 }
  0x3f   : > { %722 = shalt.err (!%p719_p13)
}
  0x40   : > { %625 = dma.hbm_to_vmem [thread:$0]  (!%p863_p8), %s908_s30, 128, %s257_s14, %s246_s16  }
  0x41   : > { %p1014_p6 = scmp.ne.s32.totalorder %s1013_s21, 0 }
  0x42   : > { %s267_s8 = sand.u32 (!%p1014_p6), 1, %s753_s25   ;;  %p1015_p12 = scmp.ne.s32.totalorder (!%p1014_p6), %s1009_s10, 0 }
  0x43   : > { %265 = sbr.rel (%p1014_p6) target bundleno = 455 (0x1c7), region = 36  ;;  %s598_s18 = sshll.u32 (!%p1014_p6), %s267_s8, 3 }
  0x44   : > { %s268_s20 = scalar_lea.sflag (!%p1014_p6), [#allocation3], %s267_s8  ;;  %s271_s15 = scalar_lea.vmem (!%p1014_p6), [#allocation2], %s598_s18 }
  0x4a   : > { %740 = dma.done.wait (%p1015_p12), %s268_s20, 128  }
  0x4b   : > { %742 = vsyncadd (%p1015_p12), %s268_s20, 4294967168  ;;  %s277_s13 = scalar_lea.sflag [#allocation5], %s267_s8  ;;  %s280_s17 = scalar_lea.vmem [#allocation4], %s598_s18 }
  0x4c   : > { %744 = dma.done.wait (%p1015_p12), %s277_s13, 128  }
  0x4d   : > { %746 = vsyncadd (%p1015_p12), %s277_s13, 4294967168  ;;  %p600_p7 = scmp.ne.s32.totalorder %s589_s28, 0 }
  0x4e   : > { %vm315_vm0 = vcmask (!%p600_p7), 7168   ;;  %v765_v0 = vmov (!%p600_p7), 0.0  }
  0x4f   : > { %314 = sbr.rel (%p600_p7) target bundleno = 86 (0x56), region = 48  ;;  %316 = vst.msk [vmem:[%s1004_s4] sm:$0xff] (!%p600_p7), %vm315_vm0, %v765_v0  ;;  %317 = vst.msk [vmem:[%s1005_s5] sm:$0xff] (!%p600_p7), %vm315_vm0, %v765_v0 }
  0x50   : > { %318 = vst.msk [vmem:[%s1006_s6] sm:$0xff] (!%p600_p7), %vm315_vm0, %v765_v0  ;;  %319 = vst.msk [vmem:[%s1007_s7] sm:$0xff] (!%p600_p7), %vm315_vm0, %v765_v0 }
  0x56 PF: > { %v321_v1 = vld [vmem:[%s271_s15] sm:$0xff]  ;;  %vm328_vm1 = vcmask 1043456   ;;  %v405_v2 = vld [vmem:[%s280_s17] sm:$0xff]  ;;  %v766_v4 = vmov 0.0   ;;  %vm406_vm2 = vcmask 64512   ;;  %vm767_vm3 = vmmov 0  }
  0x57   : > { %v323_v3 = vcombine.high %v321_v1, %v321_v1  ;;  %610 = vmatprep.subr.mxu1 %v766_v4  ;;  %397 = vmatprep.mubr.f32.mxu0 %v766_v4  ;;  %v404_v5 = vld [vmem:[%s1003_s3] sm:$0xff]  ;;  %vm324_vm4 = vcmask 31744   ;;  %vm496_vm5 = vcmask 523264   ;;  %vm485_vm6 = vcmask 7168  }
  0x58   : > { %611 = vmatpush3.msra.mxu1 %v405_v2  ;;  %612 = vmatprep.mubr.msk.f32.mxu1 %vm767_vm3, %v766_v4  ;;  %v320_v6 = vld [vmem:[%s1002_s2] sm:$0xff] }
  0x59   : > { %601 = vmatprep.subr.msk.mxu0 %vm328_vm1, %v323_v3  ;;  %613 = vmatmul.mubr.msk.f32.vlgmr.msra.gmra.mrb[0].mxu1 %vm406_vm2, %v404_v5  ;;  %v495_v18 = vld [vmem:[%s1006_s6] sm:$0xff] }
  0x5a   : > { %602 = vmatpush1.msk.msra.mxu0 %vm328_vm1, %v321_v1  ;;  %v480_v21 = vld [vmem:[%s1004_s4] sm:$0xff] }
  0x5b   : > { %603 = vmatmul.mubr.msk.f32.vlgmr.msra.gmra.mrb[0].mxu0 %vm324_vm4, %v320_v6  ;;  %v502_v22 = vld [vmem:[%s1007_s7] sm:$0xff] }
  0x5c   : > { %v487_v27 = vld [vmem:[%s1005_s5] sm:$0xff] }
 0x12c   : > { %v476_v7 = vpop.f32.mrb[0].mxu1 }
 0x12d   : > { %v503_v8 = vmul.f32 %v476_v7, %v476_v7  ;;  %v497_v9 = vsel %vm496_vm5, %v476_v7, 0.0  ;;  %v614_v10 = vpop.f32.mrb[1].mxu1 }
 0x12e   : > { %v399_v11 = vpop.f32.mrb[0].mxu0  ;;  %498 = vadd.xlane.f32.xlu1 %v497_v9 }
 0x12f   : > { %v488_v12 = vmul.f32 %v399_v11, %v399_v11  ;;  %v401_v13 = vpop.f32.mrb[1].mxu0  ;;  %v504_v14 = vsel %vm496_vm5, %v503_v8, 0.0 }
 0x130   : > { %v489_v15 = vmul.f32 %v401_v13, %v401_v13  ;;  %v481_v16 = vadd.f32 %v401_v13, %v399_v11 }
 0x132   : > { %482 = vadd.xlane.f32.xlu0 %v481_v16  ;;  %505 = vadd.xlane.f32.xlu1 %v504_v14  ;;  %v490_v17 = vadd.f32 %v489_v15, %v488_v12 }
 0x136   : > { %491 = vadd.xlane.f32.xlu0 %v490_v17 }
 0x1bb   : > { %v499_v19 = vpop.xlane.xlu1 %498 }
 0x1bc   : > { %v500_v20 = vadd.f32 %v499_v19, %v495_v18 }
 0x1be   : > { %501 = vst.msk [vmem:[%s1006_s6] sm:$0xff] %vm485_vm6, %v500_v20 }
 0x1bf   : > { %v483_v23 = vpop.xlane.xlu0 %482  ;;  %v506_v24 = vpop.xlane.xlu1 %505 }
 0x1c0   : > { %v484_v25 = vadd.f32 %v483_v23, %v480_v21  ;;  %v507_v26 = vadd.f32 %v506_v24, %v502_v22 }
 0x1c2   : > { %486 = vst.msk [vmem:[%s1004_s4] sm:$0xff] %vm485_vm6, %v484_v25  ;;  %508 = vst.msk [vmem:[%s1007_s7] sm:$0xff] %vm485_vm6, %v507_v26 }
 0x1c3   : > { %v492_v28 = vpop.xlane.xlu0 %491 }
 0x1c4   : > { %v493_v29 = vadd.f32 %v492_v28, %v487_v27 }
 0x1c6   : > { %494 = vst.msk [vmem:[%s1005_s5] sm:$0xff] %vm485_vm6, %v493_v29 }
 0x1c7 PF: > { %p21_p8 = scmp.ge.s32.totalorder %s828_s29, 4   ;;  %s1016_s24 = smov %s753_s25 }
 0x1c8   : > { %s1017_s25 = smov %s757_s26  ;;  %s1018_s26 = smov %s838_s9 }
 0x1c9   : > { %s1019_s27 = smov %s828_s29  ;;  %23 = sbr.rel (!%p21_p8) target bundleno = 5 (0x5), region = 113 }
 0x1d0   :  { %538 = vsyncpa [#allocation3], 1 }
 0x1d1   :  { %540 = vsyncpa [#allocation3 + $0x1], 1 }
 0x1d2   :  { %541 = vsyncpa [#allocation5], 1 }
 0x1d3   :  { %543 = vsyncpa [#allocation5 + $0x1], 1 }

</bundles_post_ra>
